<compile_context>
chip_gen: v6e
topology: v6e:2x2x1
jax: 0.10.0
libtpu: 0.0.40
codegen_flags: <defaults>
</compile_context>

<pallas_src>
import functools

import jax
import jax.numpy as jnp
from jax.experimental import pallas as pl
from jax.experimental.pallas import tpu as pltpu


# ----------------------------------------------------------------------------
# Helpers: VMEM capacity query + tile-size selection
# ----------------------------------------------------------------------------
def _vmem_capacity_bytes():
    try:
        return int(pltpu.get_tpu_info().vmem_capacity_bytes)
    except Exception:
        return 64 << 20  # conservative fallback (v7x per-core VMEM)


def _pick_tile_rows(N, D, P, B, x_itemsize):
    """Row-tile size for the [tn, D] input blocks.

    Constraints (in priority order):
      * at least 8 total grid steps (>= 4 per TensorCore under v7x megacore)
        whenever N allows it, so the pipeline has something to overlap;
      * hard cap of 512 rows (64 MiB VMEM parts) / 1024 rows (128 MiB parts) —
        the HBM roofline is already saturated around ~512 rows;
      * fit a per-chip VMEM budget, modelling double-buffered input rows,
        lane-padded double-buffered output rows and the f32 temporaries of the
        sum-of-squares reduction;
      * multiple of the sublane packing (8 rows for f32, 16 for bf16).
    """
    capacity = _vmem_capacity_bytes()
    small_vmem = capacity <= (64 << 20)            # v7x-class part
    mult = 8 if x_itemsize >= 4 else 16

    out_lanes = ((max(P, 1) + 127) // 128) * 128   # lane-padded output row
    per_row = 2 * D * x_itemsize + 2 * out_lanes * x_itemsize + 8 * D
    budget = (20 << 20) if small_vmem else (48 << 20)
    hard_cap = 512 if small_vmem else 1024

    tn = max(mult, min(hard_cap, budget // max(per_row, 1)))

    # Require >= 8 total grid steps when the problem is big enough.
    min_steps_per_batch = -(-8 // max(B, 1))       # ceil(8 / B)
    per_batch_cap = N // min_steps_per_batch
    if per_batch_cap >= mult:
        tn = min(tn, per_batch_cap)

    tn = max(mult, (tn // mult) * mult)            # sublane-packed
    tn = min(tn, ((N + mult - 1) // mult) * mult)  # never exceed rounded-up N
    return max(tn, mult)


# ----------------------------------------------------------------------------
# Hot kernel: LayerNorm-after-matmul with pre-folded modulation weights.
#   grid = (B, ceil(N / tn)); each step handles one [tn, D] tile of one batch.
# ----------------------------------------------------------------------------
def _final_kernel(x_ref, w_ref, csum_ref, bias_ref, o_ref, *, eps, inv_d):
    """out = rstd * (x @ W'_b - mean * colsum_b) + b'_b.

    Algebraically identical to (LayerNorm(x)*(1+scale)+shift) @ W + b with the
    LN-affine and adaLN modulation pre-folded into W'_b / b'_b / colsum_b in
    the wrapper.  LN statistics are computed in exact f32 on the VPU; the
    projection runs on the MXU in the weight's native dtype with f32 accum.
    """
    x = x_ref[0]                                             # [tn, D] native dtype
    xf = x.astype(jnp.float32)

    # Single-pass LN moments (two independent reductions), variance clamped
    # against catastrophic cancellation.
    mean = jnp.sum(xf, axis=-1, keepdims=True) * inv_d        # [tn, 1]
    mean_sq = jnp.sum(xf * xf, axis=-1, keepdims=True) * inv_d
    var = jnp.maximum(mean_sq - mean * mean, 0.0)
    rstd = jax.lax.rsqrt(var + eps)                           # [tn, 1]

    # MXU projection on raw x; LN applied afterwards via the colsum identity.
    y = jnp.dot(x.astype(w_ref.dtype), w_ref[0],
                preferred_element_type=jnp.float32)           # [tn, P] f32

    out = rstd * (y - mean * csum_ref[0]) + bias_ref[0]       # [tn, P] f32
    o_ref[0] = out.astype(o_ref.dtype)


def final_layer_core(vid_emb, w_fold, colsum, bias_fold, *, eps, tn=None):
    B, N, D = vid_emb.shape
    P = w_fold.shape[-1]
    if tn is None:
        tn = _pick_tile_rows(N, D, P, B, vid_emb.dtype.itemsize)

    # VMEM budget: double-buffered in/out tiles + per-batch folded weight +
    # f32 temporaries; cap the scoped limit at ~40 MiB on 64 MiB parts.
    x_item = vid_emb.dtype.itemsize
    out_lanes = ((P + 127) // 128) * 128
    small_vmem = _vmem_capacity_bytes() <= (64 << 20)
    est = (2 * tn * D * x_item
           + 2 * tn * out_lanes * x_item
           + 2 * D * P * w_fold.dtype.itemsize
           + 12 * tn * D
           + (2 << 20))
    ceiling = (40 << 20) if small_vmem else (100 << 20)
    vmem_limit = int(min(max(est, 32 << 20), ceiling))

    kernel = functools.partial(_final_kernel, eps=float(eps), inv_d=1.0 / D)

    return pl.pallas_call(
        kernel,
        out_shape=jax.ShapeDtypeStruct((B, N, P), vid_emb.dtype),
        grid=(B, pl.cdiv(N, tn)),                 # partial last block is masked
        in_specs=[
            pl.BlockSpec((1, tn, D), lambda b, n: (b, n, 0)),  # vid_emb tile
            pl.BlockSpec((1, D, P), lambda b, n: (b, 0, 0)),   # folded weight[b]
            pl.BlockSpec((1, 1, P), lambda b, n: (b, 0, 0)),   # colsum[b]  (f32)
            pl.BlockSpec((1, 1, P), lambda b, n: (b, 0, 0)),   # folded bias[b] (f32)
        ],
        out_specs=pl.BlockSpec((1, tn, P), lambda b, n: (b, n, 0)),
        compiler_params=pltpu.CompilerParams(
            dimension_semantics=("parallel", "parallel"),
            vmem_limit_bytes=vmem_limit),
    )(vid_emb, w_fold, colsum, bias_fold)


# ----------------------------------------------------------------------------
# Glue: unpatchify  "b (f h w) (c p q) -> b f c (h p) (w q)"  (pure reshape/transpose)
# ----------------------------------------------------------------------------
def unpatchify(x, *, c, p, w, h):
    B, N, _ = x.shape
    f = N // (h * w)
    x = x.reshape(B, f, h, w, c, p, p)
    x = x.transpose(0, 1, 4, 2, 5, 3, 6)          # b f c h p w q
    return x.reshape(B, f, c, h * p, w * p)


# ----------------------------------------------------------------------------
# Full FinalLayer forward
# ----------------------------------------------------------------------------
def final_layer_forward(vid_emb, t_emb, params, *, out_channels, patch_size,
                        latent_height, latent_width, eps=1e-5, tn=None):
    B, N, D = vid_emb.shape

    # --- adaLN modulation + all algebraic folds in plain XLA (micro-sized). ---
    t = t_emb.astype(jnp.float32)
    w_ada = params["adaln_w"].astype(jnp.float32)
    b_ada = params["adaln_b"].astype(jnp.float32)
    mod = jax.nn.silu(t) @ w_ada + b_ada                     # [B, 2D]
    shift, scale = mod[:, :D], mod[:, D:]                    # torch .chunk(2, dim=1)

    gamma = params["ln_gamma"].astype(jnp.float32)
    beta = params["ln_beta"].astype(jnp.float32)
    esc = (1.0 + scale) * gamma[None, :]                     # [B, D]
    esh = (1.0 + scale) * beta[None, :] + shift              # [B, D]

    w_lin = params["lin_w"].astype(jnp.float32)              # [D, P]
    b_lin = params["lin_b"].astype(jnp.float32)              # [P]
    P = w_lin.shape[1]

    # Fold modulation into per-batch projection weights (exact algebra):
    #   (xhat*esc + esh) @ W + b = xhat @ (diag(esc) W) + (esh @ W + b)
    #   xhat @ W' = rstd * (x @ W' - mean * colsum),  colsum = esc @ W.
    w_dtype = jnp.bfloat16 if vid_emb.dtype == jnp.bfloat16 else jnp.float32
    w_fold = (esc[:, :, None] * w_lin[None, :, :]).astype(w_dtype)  # [B, D, P]
    colsum = (esc @ w_lin).reshape(B, 1, P)                         # [B, 1, P] f32
    bias_fold = (esh @ w_lin + b_lin[None, :]).reshape(B, 1, P)     # [B, 1, P] f32

    out = final_layer_core(vid_emb, w_fold, colsum, bias_fold, eps=eps, tn=tn)

    return unpatchify(out, c=out_channels, p=patch_size,
                      w=latent_width // patch_size,
                      h=latent_height // patch_size)


# ----------------------------------------------------------------------------
# Pure-JAX reference (mirrors the PyTorch forward) for a numerical sanity check.
# ----------------------------------------------------------------------------
def _reference_forward(vid_emb, t_emb, params, *, out_channels, patch_size,
                       latent_height, latent_width, eps):
    D = vid_emb.shape[-1]
    mod = jax.nn.silu(t_emb) @ params["adaln_w"] + params["adaln_b"]
    shift, scale = mod[:, :D], mod[:, D:]
    mu = jnp.mean(vid_emb, axis=-1, keepdims=True)
    var = jnp.mean((vid_emb - mu) ** 2, axis=-1, keepdims=True)
    xhat = (vid_emb - mu) / jnp.sqrt(var + eps)
    xln = xhat * params["ln_gamma"] + params["ln_beta"]
    xm = xln * (1.0 + scale[:, None, :]) + shift[:, None, :]
    y = xm @ params["lin_w"] + params["lin_b"]
    return unpatchify(y, c=out_channels, p=patch_size,
                      w=latent_width // patch_size,
                      h=latent_height // patch_size)


if __name__ == "__main__":
    # Small config: model_dim=32, time_embed_dim=16, patch_size=2,
    # out_channels=4, latent H=W=8 -> h=w=4 patches, frames F=2 -> N=32 tokens.
    B = 2
    model_dim = 32
    time_embed_dim = 16
    patch_size = 2
    out_channels = 4
    latent_h = latent_w = 8
    frames = 2
    n_tokens = frames * (latent_h // patch_size) * (latent_w // patch_size)  # 32
    proj_dim = patch_size * patch_size * out_channels                        # 16

    key = jax.random.PRNGKey(0)
    keys = jax.random.split(key, 8)

    vid_emb = jax.random.normal(keys[0], (B, n_tokens, model_dim), jnp.float32)
    t_emb = jax.random.normal(keys[1], (B, time_embed_dim), jnp.float32)

    params = {
        # adaLN_modulation: Linear(time_embed_dim, 2 * model_dim)
        "adaln_w": 0.05 * jax.random.normal(keys[2], (time_embed_dim, 2 * model_dim), jnp.float32),
        "adaln_b": 0.01 * jax.random.normal(keys[3], (2 * model_dim,), jnp.float32),
        # LayerNorm(model_dim, elementwise_affine=True)
        "ln_gamma": jnp.ones((model_dim,), jnp.float32),
        "ln_beta": jnp.zeros((model_dim,), jnp.float32),
        # linear: Linear(model_dim, p*p*out_channels)
        "lin_w": 0.05 * jax.random.normal(keys[4], (model_dim, proj_dim), jnp.float32),
        "lin_b": 0.01 * jax.random.normal(keys[5], (proj_dim,), jnp.float32),
    }

    out = final_layer_forward(
        vid_emb, t_emb, params,
        out_channels=out_channels, patch_size=patch_size,
        latent_height=latent_h, latent_width=latent_w,
        eps=1e-5,
    )
    out = jax.block_until_ready(out)
    assert out.shape == (B, frames, out_channels, latent_h, latent_w), out.shape

    ref = _reference_forward(
        vid_emb, t_emb, params,
        out_channels=out_channels, patch_size=patch_size,
        latent_height=latent_h, latent_width=latent_w, eps=1e-5)
    ref = jax.block_until_ready(ref)
    max_err = float(jnp.max(jnp.abs(out - ref)))
    assert max_err < 2e-2, f"max abs error vs reference: {max_err}"

    print("KERNEL_OK")
</pallas_src>

<mosaic_0001>
module attributes {stable_mosaic.version = 11 : i64} {
  func.func @_final_kernel(%arg0: i32, %arg1: i32, %arg2: memref<1x8x32xf32, #tpu.memory_space<vmem>>, %arg3: memref<1x32x16xf32, #tpu.memory_space<vmem>>, %arg4: memref<1x1x16xf32, #tpu.memory_space<vmem>>, %arg5: memref<1x1x16xf32, #tpu.memory_space<vmem>>, %arg6: memref<1x8x16xf32, #tpu.memory_space<vmem>>) attributes {dimension_semantics = [#tpu.dimension_semantics<parallel>, #tpu.dimension_semantics<parallel>], iteration_bounds = array<i64: 2, 4>, scalar_prefetch = 0 : i64, scratch_operands = 0 : i64, tpu.core_type = #tpu.core_type<tc>, window_params = [{transform_indices = @transform_0, window_bounds = array<i64: 1, 8, 32>}, {transform_indices = @transform_1, window_bounds = array<i64: 1, 32, 16>}, {transform_indices = @transform_2, window_bounds = array<i64: 1, 1, 16>}, {transform_indices = @transform_3, window_bounds = array<i64: 1, 1, 16>}, {transform_indices = @transform_4, window_bounds = array<i64: 1, 8, 16>}]} {
    %c0 = arith.constant 0 : index
    %c0_0 = arith.constant 0 : index
    %c0_1 = arith.constant 0 : index
    %0 = vector.load %arg2[%c0, %c0_0, %c0_1] : memref<1x8x32xf32, #tpu.memory_space<vmem>>, vector<1x8x32xf32>
    %1 = vector.shape_cast %0 : vector<1x8x32xf32> to vector<8x32xf32>
    %cst = arith.constant dense<0.000000e+00> : vector<8xf32>
    %2 = vector.multi_reduction <add>, %1, %cst [1] : vector<8x32xf32> to vector<8xf32>
    %3 = vector.shape_cast %2 : vector<8xf32> to vector<8x1xf32>
    %cst_2 = arith.constant 3.125000e-02 : f32
    %4 = vector.broadcast %cst_2 : f32 to vector<8x1xf32>
    %5 = arith.mulf %3, %4 : vector<8x1xf32>
    %6 = arith.mulf %1, %1 : vector<8x32xf32>
    %cst_3 = arith.constant dense<0.000000e+00> : vector<8xf32>
    %7 = vector.multi_reduction <add>, %6, %cst_3 [1] : vector<8x32xf32> to vector<8xf32>
    %8 = vector.shape_cast %7 : vector<8xf32> to vector<8x1xf32>
    %cst_4 = arith.constant 3.125000e-02 : f32
    %9 = vector.broadcast %cst_4 : f32 to vector<8x1xf32>
    %10 = arith.mulf %8, %9 : vector<8x1xf32>
    %11 = arith.mulf %5, %5 : vector<8x1xf32>
    %12 = arith.subf %10, %11 : vector<8x1xf32>
    %cst_5 = arith.constant 0.000000e+00 : f32
    %13 = vector.broadcast %cst_5 : f32 to vector<8x1xf32>
    %14 = arith.maximumf %12, %13 : vector<8x1xf32>
    %cst_6 = arith.constant 9.99999974E-6 : f32
    %15 = vector.broadcast %cst_6 : f32 to vector<8x1xf32>
    %16 = arith.addf %14, %15 : vector<8x1xf32>
    %17 = math.rsqrt %16 : vector<8x1xf32>
    %c0_7 = arith.constant 0 : index
    %c0_8 = arith.constant 0 : index
    %c0_9 = arith.constant 0 : index
    %18 = vector.load %arg3[%c0_7, %c0_8, %c0_9] : memref<1x32x16xf32, #tpu.memory_space<vmem>>, vector<1x32x16xf32>
    %19 = vector.shape_cast %18 : vector<1x32x16xf32> to vector<32x16xf32>
    %cst_10 = arith.constant dense<0.000000e+00> : vector<8x16xf32>
    %20 = tpu.matmul %1, %19, %cst_10 {dimension_numbers = #tpu.dot_dimension_numbers<[1], [0], [0], [1], [0, 0, 1, 1], [], []>} : vector<8x32xf32>, vector<32x16xf32>, vector<8x16xf32> -> vector<8x16xf32>
    %c0_11 = arith.constant 0 : index
    %c0_12 = arith.constant 0 : index
    %c0_13 = arith.constant 0 : index
    %21 = vector.load %arg4[%c0_11, %c0_12, %c0_13] : memref<1x1x16xf32, #tpu.memory_space<vmem>>, vector<1x1x16xf32>
    %22 = vector.shape_cast %21 : vector<1x1x16xf32> to vector<1x16xf32>
    %23 = vector.broadcast %5 : vector<8x1xf32> to vector<8x16xf32>
    %24 = vector.broadcast %22 : vector<1x16xf32> to vector<8x16xf32>
    %25 = arith.mulf %23, %24 : vector<8x16xf32>
    %26 = arith.subf %20, %25 : vector<8x16xf32>
    %27 = vector.broadcast %17 : vector<8x1xf32> to vector<8x16xf32>
    %28 = arith.mulf %27, %26 : vector<8x16xf32>
    %c0_14 = arith.constant 0 : index
    %c0_15 = arith.constant 0 : index
    %c0_16 = arith.constant 0 : index
    %29 = vector.load %arg5[%c0_14, %c0_15, %c0_16] : memref<1x1x16xf32, #tpu.memory_space<vmem>>, vector<1x1x16xf32>
    %30 = vector.shape_cast %29 : vector<1x1x16xf32> to vector<1x16xf32>
    %31 = vector.broadcast %30 : vector<1x16xf32> to vector<8x16xf32>
    %32 = arith.addf %28, %31 : vector<8x16xf32>
    %c0_17 = arith.constant 0 : index
    %c0_18 = arith.constant 0 : index
    %c0_19 = arith.constant 0 : index
    %33 = vector.load %arg6[%c0_17, %c0_18, %c0_19] : memref<1x8x16xf32, #tpu.memory_space<vmem>>, vector<1x8x16xf32>
    %34 = vector.shape_cast %33 : vector<1x8x16xf32> to vector<8x16xf32>
    %35 = vector.shape_cast %32 : vector<8x16xf32> to vector<1x8x16xf32>
    tpu.vector_store %arg6[%c0_17, %c0_18, %c0_19], %35 {strides = array<i32>} : memref<1x8x16xf32, #tpu.memory_space<vmem>>, vector<1x8x16xf32>,
    return
  }
  func.func @transform_0(%arg0: i32, %arg1: i32) -> (i32, i32, i32) {
    %c0_i32 = arith.constant 0 : i32
    %c0_i32_0 = arith.constant 0 : i32
    return %arg0, %arg1, %c0_i32 : i32, i32, i32
  }
  func.func @transform_1(%arg0: i32, %arg1: i32) -> (i32, i32, i32) {
    %c0_i32 = arith.constant 0 : i32
    %c0_i32_0 = arith.constant 0 : i32
    %c0_i32_1 = arith.constant 0 : i32
    return %arg0, %c0_i32, %c0_i32_0 : i32, i32, i32
  }
  func.func @transform_2(%arg0: i32, %arg1: i32) -> (i32, i32, i32) {
    %c0_i32 = arith.constant 0 : i32
    %c0_i32_0 = arith.constant 0 : i32
    %c0_i32_1 = arith.constant 0 : i32
    return %arg0, %c0_i32, %c0_i32_0 : i32, i32, i32
  }
  func.func @transform_3(%arg0: i32, %arg1: i32) -> (i32, i32, i32) {
    %c0_i32 = arith.constant 0 : i32
    %c0_i32_0 = arith.constant 0 : i32
    %c0_i32_1 = arith.constant 0 : i32
    return %arg0, %c0_i32, %c0_i32_0 : i32, i32, i32
  }
  func.func @transform_4(%arg0: i32, %arg1: i32) -> (i32, i32, i32) {
    %c0_i32 = arith.constant 0 : i32
    %c0_i32_0 = arith.constant 0 : i32
    return %arg0, %arg1, %c0_i32 : i32, i32, i32
  }
}

</mosaic_0001>

<bundles_post_ra>
// kernel: tpu_custom_call.1
= control target key start
LH: loop header
LB: loop body
LE: loop exit
PB: predicated region body
PF: predicated region fallthrough
CT: control target
= control target key end

     0   :  { %s650_s15 = smov 0   ;;  %s652_s16 = smov 0   ;;  %s723_s0 = inlined_call_operand.vmem [shape: f32[2,32,32], index: 0, kind: input, shape index: {}]   ;;  %s724_s1 = inlined_call_operand.vmem [shape: f32[2,32,16], index: 1, kind: input, shape index: {}]   ;;  %s725_s2 = inlined_call_operand.vmem [shape: f32[2,1,16], index: 2, kind: input, shape index: {}]   ;;  %s726_s3 = inlined_call_operand.vmem [shape: f32[2,1,16], index: 3, kind: input, shape index: {}]   ;;  %s727_s4 = inlined_call_operand.vmem [shape: f32[2,32,16], index: 4, kind: output, shape index: {}]  }
   0x1   :  { %s654_s17 = smov 0   ;;  %s656_s18 = smov 0  }
   0x2   :  { %s658_s19 = smov 0  }
   0x3 LB: > { %s23_s20 = sadd.s32 1, %s613_s17  ;;  %s26_s21 = sadd.s32 1, %s617_s18  ;;  %s621_s19 = sphi %s658_s19, %s14_s19   ;;  %s617_s18 = sphi %s656_s18, %s731_s18   ;;  %s613_s17 = sphi %s654_s17, %s730_s17   ;;  %s609_s16 = sphi %s652_s16, %s729_s16   ;;  %s605_s15 = sphi %s650_s15, %s728_s15  }
   0x4   : > { %p24_p0 = scmp.ge.s32.totalorder %s23_s20, 4  ;;  %p510_p1 = scmp.ge.s32.totalorder %s621_s19, 1 }
   0x5   : > { %p207_p2 = scmp.lt.s32.totalorder %s621_s19, 9 }
   0x6   : > { %s733_s20 = smov (%p24_p0, %s23_s20), 0  ;;  %s735_s21 = smov (!%p24_p0, %s26_s21), %s617_s18 }
   0x7   : > { %p208_p3 = pnand %p510_p1, %p207_p2  ;;  %p28_p4 = scmp.ge.s32.totalorder %s735_s21, 2 }
   0x8   : > { %p250_p5 = scmp.lt.s32.totalorder (!%p208_p3), %s609_s16, 1  ;;  %p252_p6 = scmp.lt.s32.totalorder (!%p208_p3), %s605_s15, 3 }
   0x9   : > { %s737_s21 = smov (%p28_p4, %s735_s21), 0  ;;  %211 = sbr.rel (%p208_p3) target bundleno = 225 (0xe1), region = 36 }
   0xe   : > { %v623_v0 = vmov 0.0   ;;  %vm624_vm0 = vmmov 0   ;;  %s739_s16 = smov (!%p250_p5, %s609_s16), 1  ;;  %s741_s15 = smov (!%p252_p6, %s605_s15), 3  ;;  %vm278_vm1 = vcmask 261120   ;;  %vm388_vm2 = vcmask 130048  }
   0xf   : > { %528 = vmatprep.subr.mxu0 %v623_v0  ;;  %536 = vmatprep.mubr.msk.f32.mxu0 %vm624_vm0, %v623_v0  ;;  %s522_s22 = sshll.u32 %s739_s16, 5  ;;  %s511_s23 = sshll.u32 %s739_s16, 2 }
  0x10   : > { %s262_s26 = scalar_lea.vmem %s724_s1, %s522_s22  ;;  %s687_s27 = sadd.s32 %s511_s23, %s741_s15 }
  0x11   : > { %v296_v1 = vld [vmem:[%s262_s26 + $0x18] sm:$0xff]  ;;  %v295_v2 = vld [vmem:[%s262_s26 + $0x10] sm:$0xff]  ;;  %s512_s28 = sshll.u32 %s687_s27, 3  ;;  %v294_v3 = vld [vmem:[%s262_s26 + $0x8] sm:$0xff]  ;;  %s265_s8 = scalar_lea.vmem %s725_s2, %s739_s16 }
  0x12   : > { %529 = vmatpush3.msra.mxu0 %v296_v1  ;;  %s257_s5 = scalar_lea.vmem %s723_s0, %s512_s28  ;;  %v293_v7 = vld [vmem:[%s262_s26] sm:$0xff]  ;;  %s268_s11 = scalar_lea.vmem %s726_s3, %s739_s16 }
  0x13   : > { %530 = vmatprep.subr.mxu0 %v623_v0  ;;  %v277_v4 = vld [vmem:[%s257_s5] sm:$0xff]  ;;  %s276_s14 = scalar_lea.vmem %s727_s4, %s512_s28 }
  0x14   : > { %531 = vmatpush3.msra.mxu0 %v295_v2  ;;  %v279_v5 = vsel %vm278_vm1, %v277_v4, 0.0  ;;  %v283_v6 = vmul.f32 %v277_v4, %v277_v4  ;;  %v518_v17 = vld [vmem:[%s265_s8] ss:$0 sm:$0xff] }
  0x15   : > { %532 = vmatprep.subr.mxu0 %v623_v0  ;;  %280 = vadd.xlane.f32.xlu0 %v279_v5  ;;  %v519_v22 = vld [vmem:[%s268_s11] ss:$0 sm:$0xff] }
  0x16   : > { %533 = vmatpush3.msra.mxu0 %v294_v3  ;;  %v284_v8 = vsel %vm278_vm1, %v283_v6, 0.0 }
  0x17   : > { %534 = vmatprep.subr.mxu0 %v623_v0 }
  0x18   : > { %535 = vmatpush3.msra.mxu0 %v293_v7 }
  0x19   : > { %537 = vmatmul.mubr.msk.f32.vlgmr.msra.gmra.mxu0 %vm278_vm1, %v277_v4  ;;  %285 = vadd.xlane.f32.xlu0 %v284_v8 }
  0x9e   : > { %v281_v9 = vpop.xlane.xlu0 %280 }
  0x9f   : > { %v282_v10 = vmul.f32 0.03125, %v281_v9 }
  0xa1   : > { %v288_v12 = vmul.f32 %v282_v10, %v282_v10  ;;  %v377_v18 = vmul.f32 %v518_v17, %v282_v10 }
  0xa2   : > { %v286_v11 = vpop.xlane.xlu0 %285 }
  0xa3   : > { %v287_v13 = vmul.f32 0.03125, %v286_v11 }
  0xa5   : > { %v289_v14 = vsub.f32 %v287_v13, %v288_v12 }
  0xa7   : > { %v290_v15 = vmax.f32 %v289_v14, 0.0 }
  0xa9   : > { %v291_v16 = vadd.f32 1e-05, %v290_v15 }
  0xab   : > { %581 = vrsqrt.f32 %v291_v16 }
  0xb8   : > { %v582_v21 = vpop.eup %581 }
  0xd9   : > { %v366_v19 = vpop.f32.mrf.mxu0 }
  0xda   : > { %v378_v20 = vsub.f32 %v366_v19, %v377_v18 }
  0xdb   : > { %v538_v23 = vpop.f32.mrf.mxu0 }
  0xdc   : > { %v379_v24 = vmul.f32 %v582_v21, %v378_v20 }
  0xde   : > { %v387_v25 = vadd.f32 %v519_v22, %v379_v24 }
  0xe0   : > { %389 = vst.msk [vmem:[%s276_s14] sm:$0xff] %vm388_vm2, %v387_v25 }
  0xe1 PF: > { %s14_s19 = sadd.s32 1, %s621_s19   ;;  %s728_s15 = smov %s613_s17 }
  0xe2   : > { %p11_p7 = scmp.ge.s32.totalorder %s14_s19, 10   ;;  %s729_s16 = smov %s617_s18 }
  0xe3   : > { %s730_s17 = smov %s733_s20  ;;  %s731_s18 = smov %s737_s21 }
  0xe4   :  { %13 = sbr.rel (!%p11_p7) target bundleno = 3 (0x3), region = 75 }

</bundles_post_ra>
